<compile_context>
chip_gen: v7x
topology: tpu7x:2x2x1
jax: 0.10.0
libtpu: 0.0.40
codegen_flags: <defaults>
</compile_context>

<pallas_src>
import jax
import jax.numpy as jnp
from jax.experimental import pallas as pl
from jax.experimental.pallas import tpu as pltpu


# ----------------------------------------------------------------------------
# Fused MLP kernel (feature-major): x^T tile (10, tb) -> y^T tile (3, tb)
# ----------------------------------------------------------------------------
def stress_mlp_kernel(xt_ref, w1t_ref, w2t_ref, w3t_ref, bias_ref, o_ref):
    # Lane-dense activation tile; HBM stream is f32, cast to bf16 for the MXU.
    xb = xt_ref[...].astype(jnp.bfloat16)                 # (10, tb)

    # Packed bias columns (one resident DMA, static sublane slices),
    # broadcast along the lane (batch) axis.  Kept in f32.
    b1 = bias_ref[0:32, :]                                # (32, 1)
    b2 = bias_ref[32:48, :]                               # (16, 1)  (BN folded)
    b3 = bias_ref[48:51, :]                               # (3, 1)

    # Layer 1: Linear(10, 32) + ReLU           (W1^T @ x^T)
    h1 = jnp.dot(w1t_ref[...], xb, preferred_element_type=jnp.float32)
    h1 = jnp.maximum(h1 + b1, 0.0)                        # (32, tb) f32

    # Layer 2: Linear(32, 16) + ReLU.  BatchNorm1d (eval) + Dropout (identity)
    # are folded into w2t_ref / b2 at parameter-prep time.
    h2 = jnp.dot(w2t_ref[...], h1.astype(jnp.bfloat16),
                 preferred_element_type=jnp.float32)
    h2 = jnp.maximum(h2 + b2, 0.0)                        # (16, tb) f32

    # Layer 3: Linear(16, 3)
    o_ref[...] = jnp.dot(w3t_ref[...], h2.astype(jnp.bfloat16),
                         preferred_element_type=jnp.float32) + b3


def _round_up(n, m):
    return ((n + m - 1) // m) * m


def _choose_tile(B, max_tile):
    """Batch tile: multiple of 128 lanes; >=2 grid steps when B allows (v7x)."""
    lane = 128
    padded = _round_up(B, lane)
    if padded >= 2 * lane:
        tb = min(max_tile, _round_up((padded + 1) // 2, lane))
    else:
        tb = padded
    return tb


def stress_analysis_forward(x, fused_params, *, max_tile=8192):
    """Fused StressAnalysisModel forward on TPU.

    x: (B, 10) f32.  fused_params = (w1t_bf16, w2t_bf16, w3t_bf16, bias_pack_f32).
    Returns (B, 3) f32.
    """
    w1t, w2t, w3t, bias_pack = fused_params
    B = x.shape[0]

    tb = _choose_tile(B, max_tile)
    padded_b = _round_up(B, tb)

    # Feature-major layout copy (needed anyway); ragged tail zero-filled in the
    # same buffer build -> no separate full-array jnp.pad pass.
    if padded_b == B:
        xt = x.T                                          # (10, B)
    else:
        xt = jnp.zeros((10, padded_b), x.dtype).at[:, :B].set(x.T)

    grid = (padded_b // tb,)

    out_t = pl.pallas_call(
        stress_mlp_kernel,
        out_shape=jax.ShapeDtypeStruct((3, padded_b), jnp.float32),
        grid_spec=pltpu.PrefetchScalarGridSpec(
            num_scalar_prefetch=0,
            grid=grid,
            in_specs=[
                # Streaming lane-dense activation tiles.
                pl.BlockSpec((10, tb), lambda i: (0, i)),
                # Weights + packed biases: constant block index -> VMEM
                # resident, fetched once across the whole grid.
                pl.BlockSpec(w1t.shape, lambda i: (0, 0)),
                pl.BlockSpec(w2t.shape, lambda i: (0, 0)),
                pl.BlockSpec(w3t.shape, lambda i: (0, 0)),
                pl.BlockSpec(bias_pack.shape, lambda i: (0, 0)),
            ],
            out_specs=pl.BlockSpec((3, tb), lambda i: (0, i)),
        ),
        compiler_params=pltpu.CompilerParams(
            dimension_semantics=("parallel",)),   # v7x: shard batch over 2 TCs
    )(xt, w1t, w2t, w3t, bias_pack)

    return out_t[:, :B].T                                 # (B, 3)


# ----------------------------------------------------------------------------
# Parameters: raw (PyTorch-equivalent) params and the fused/packed form.
# ----------------------------------------------------------------------------
def init_raw_params(key):
    keys = jax.random.split(key, 8)

    def linear_init(kw, kb, fan_in, fan_out):
        # PyTorch nn.Linear default: U(-1/sqrt(fan_in), 1/sqrt(fan_in))
        bound = 1.0 / jnp.sqrt(float(fan_in))
        w = jax.random.uniform(kw, (fan_in, fan_out), jnp.float32, -bound, bound)
        b = jax.random.uniform(kb, (fan_out,), jnp.float32, -bound, bound)
        return w, b

    w1, b1 = linear_init(keys[0], keys[1], 10, 32)
    w2, b2 = linear_init(keys[2], keys[3], 32, 16)
    w3, b3 = linear_init(keys[4], keys[5], 16, 3)

    # BatchNorm1d(32) eval-mode state.
    gamma = 1.0 + 0.1 * jax.random.normal(keys[6], (32,), jnp.float32)
    beta = 0.1 * jax.random.normal(keys[7], (32,), jnp.float32)
    running_mean = jnp.zeros((32,), jnp.float32)
    running_var = jnp.ones((32,), jnp.float32)
    eps = 1e-5
    return (w1, b1, gamma, beta, running_mean, running_var, eps, w2, b2, w3, b3)


def fuse_params(raw):
    """Fold eval-mode BN into Linear2, transpose weights (feature-major),
    pre-cast weights to bf16 for the MXU, and pack biases into one buffer."""
    (w1, b1, gamma, beta, running_mean, running_var, eps, w2, b2, w3, b3) = raw

    bn_scale = gamma / jnp.sqrt(running_var + eps)          # (32,)
    bn_shift = beta - running_mean * bn_scale                # (32,)

    # relu_out -> BN -> Linear2  ==  relu_out @ (diag(s) W2) + (t @ W2 + b2)
    w2_fused = bn_scale[:, None] * w2                        # (32, 16)
    b2_fused = bn_shift @ w2 + b2                            # (16,)

    # Feature-major (transposed) weights, bf16 MXU operands.
    w1t = w1.T.astype(jnp.bfloat16)                          # (32, 10)
    w2t = w2_fused.T.astype(jnp.bfloat16)                    # (16, 32)
    w3t = w3.T.astype(jnp.bfloat16)                          # (3, 16)

    # Bias column pack: rows [0,32)=b1, [32,48)=b2', [48,51)=b3.  Kept f32.
    bias_pack = jnp.zeros((64, 1), jnp.float32)
    bias_pack = bias_pack.at[0:32, 0].set(b1)
    bias_pack = bias_pack.at[32:48, 0].set(b2_fused)
    bias_pack = bias_pack.at[48:51, 0].set(b3)

    return (w1t, w2t, w3t, bias_pack)


def reference_forward(x, raw):
    """Pure-JAX f32 reference with UNFUSED eval-mode semantics."""
    (w1, b1, gamma, beta, running_mean, running_var, eps, w2, b2, w3, b3) = raw
    h = jnp.maximum(x @ w1 + b1, 0.0)
    h = gamma * (h - running_mean) / jnp.sqrt(running_var + eps) + beta
    # Dropout(0.1): identity in eval mode.
    h = jnp.maximum(h @ w2 + b2, 0.0)
    return h @ w3 + b3


if __name__ == "__main__":
    key = jax.random.PRNGKey(0)
    k_x, k_x2, k_p = jax.random.split(key, 3)

    raw_params = init_raw_params(k_p)
    fused_params = fuse_params(raw_params)

    # Primary small-shape check: batch=8, 10 features (prepare_features layout).
    batch = 8
    x = jax.random.uniform(k_x, (batch, 10), jnp.float32, 0.0, 1.0)

    out = stress_analysis_forward(x, fused_params)
    out = jax.block_until_ready(out)

    ref = reference_forward(x, raw_params)
    assert out.shape == (batch, 3)
    # bf16 MXU operands -> tolerance relaxed vs. the pure-f32 version.
    assert jnp.allclose(out, ref, atol=3e-2, rtol=3e-2), "mismatch vs reference"

    # Secondary check: ragged multi-tile batch (260 -> tb=256, grid=2)
    # exercises the zero-filled tail, pipelining, and the >=2-step grid path.
    batch2 = 260
    x2 = jax.random.uniform(k_x2, (batch2, 10), jnp.float32, 0.0, 1.0)
    out2 = jax.block_until_ready(stress_analysis_forward(x2, fused_params))
    ref2 = reference_forward(x2, raw_params)
    assert out2.shape == (batch2, 3)
    assert jnp.allclose(out2, ref2, atol=3e-2, rtol=3e-2), "tiled mismatch"

    print("KERNEL_OK")
</pallas_src>

<mosaic_0001>
module attributes {stable_mosaic.version = 11 : i64} {
  func.func @stress_mlp_kernel(%arg0: i32, %arg1: memref<10x128xf32, #tpu.memory_space<vmem>>, %arg2: memref<32x10xbf16, #tpu.memory_space<vmem>>, %arg3: memref<16x32xbf16, #tpu.memory_space<vmem>>, %arg4: memref<3x16xbf16, #tpu.memory_space<vmem>>, %arg5: memref<64x1xf32, #tpu.memory_space<vmem>>, %arg6: memref<3x128xf32, #tpu.memory_space<vmem>>) attributes {dimension_semantics = [#tpu.dimension_semantics<parallel>], iteration_bounds = array<i64: 1>, scalar_prefetch = 0 : i64, scratch_operands = 0 : i64, tpu.core_type = #tpu.core_type<tc>, window_params = [{transform_indices = @transform_0, window_bounds = array<i64: 10, 128>}, {pipeline_mode = #tpu.pipeline_mode<synchronous>, transform_indices = @transform_1, window_bounds = array<i64: 32, 10>}, {pipeline_mode = #tpu.pipeline_mode<synchronous>, transform_indices = @transform_2, window_bounds = array<i64: 16, 32>}, {pipeline_mode = #tpu.pipeline_mode<synchronous>, transform_indices = @transform_3, window_bounds = array<i64: 3, 16>}, {pipeline_mode = #tpu.pipeline_mode<synchronous>, transform_indices = @transform_4, window_bounds = array<i64: 64, 1>}, {transform_indices = @transform_5, window_bounds = array<i64: 3, 128>}]} {
    %c0 = arith.constant 0 : index
    %c0_0 = arith.constant 0 : index
    %0 = vector.load %arg1[%c0, %c0_0] : memref<10x128xf32, #tpu.memory_space<vmem>>, vector<10x128xf32>
    %1 = arith.truncf %0 : vector<10x128xf32> to vector<10x128xbf16>
    %c0_1 = arith.constant 0 : index
    %c0_2 = arith.constant 0 : index
    %2 = vector.load %arg5[%c0_1, %c0_2] : memref<64x1xf32, #tpu.memory_space<vmem>>, vector<32x1xf32>
    %c32 = arith.constant 32 : index
    %c0_3 = arith.constant 0 : index
    %3 = vector.load %arg5[%c32, %c0_3] : memref<64x1xf32, #tpu.memory_space<vmem>>, vector<16x1xf32>
    %c48 = arith.constant 48 : index
    %c0_4 = arith.constant 0 : index
    %4 = vector.load %arg5[%c48, %c0_4] : memref<64x1xf32, #tpu.memory_space<vmem>>, vector<3x1xf32>
    %c0_5 = arith.constant 0 : index
    %c0_6 = arith.constant 0 : index
    %5 = vector.load %arg2[%c0_5, %c0_6] : memref<32x10xbf16, #tpu.memory_space<vmem>>, vector<32x10xbf16>
    %cst = arith.constant dense<0.000000e+00> : vector<32x128xf32>
    %6 = tpu.matmul %5, %1, %cst {dimension_numbers = #tpu.dot_dimension_numbers<[1], [0], [0], [1], [0, 0, 1, 1], [], []>} : vector<32x10xbf16>, vector<10x128xbf16>, vector<32x128xf32> -> vector<32x128xf32>
    %7 = vector.broadcast %2 : vector<32x1xf32> to vector<32x128xf32>
    %8 = arith.addf %6, %7 : vector<32x128xf32>
    %cst_7 = arith.constant 0.000000e+00 : f32
    %9 = vector.broadcast %cst_7 : f32 to vector<32x128xf32>
    %10 = arith.maximumf %8, %9 : vector<32x128xf32>
    %c0_8 = arith.constant 0 : index
    %c0_9 = arith.constant 0 : index
    %11 = vector.load %arg3[%c0_8, %c0_9] : memref<16x32xbf16, #tpu.memory_space<vmem>>, vector<16x32xbf16>
    %12 = arith.truncf %10 : vector<32x128xf32> to vector<32x128xbf16>
    %cst_10 = arith.constant dense<0.000000e+00> : vector<16x128xf32>
    %13 = tpu.matmul %11, %12, %cst_10 {dimension_numbers = #tpu.dot_dimension_numbers<[1], [0], [0], [1], [0, 0, 1, 1], [], []>} : vector<16x32xbf16>, vector<32x128xbf16>, vector<16x128xf32> -> vector<16x128xf32>
    %14 = vector.broadcast %3 : vector<16x1xf32> to vector<16x128xf32>
    %15 = arith.addf %13, %14 : vector<16x128xf32>
    %cst_11 = arith.constant 0.000000e+00 : f32
    %16 = vector.broadcast %cst_11 : f32 to vector<16x128xf32>
    %17 = arith.maximumf %15, %16 : vector<16x128xf32>
    %c0_12 = arith.constant 0 : index
    %c0_13 = arith.constant 0 : index
    %18 = vector.load %arg4[%c0_12, %c0_13] : memref<3x16xbf16, #tpu.memory_space<vmem>>, vector<3x16xbf16>
    %19 = arith.truncf %17 : vector<16x128xf32> to vector<16x128xbf16>
    %cst_14 = arith.constant dense<0.000000e+00> : vector<3x128xf32>
    %20 = tpu.matmul %18, %19, %cst_14 {dimension_numbers = #tpu.dot_dimension_numbers<[1], [0], [0], [1], [0, 0, 1, 1], [], []>} : vector<3x16xbf16>, vector<16x128xbf16>, vector<3x128xf32> -> vector<3x128xf32>
    %21 = vector.broadcast %4 : vector<3x1xf32> to vector<3x128xf32>
    %22 = arith.addf %20, %21 : vector<3x128xf32>
    %c0_15 = arith.constant 0 : index
    %c0_16 = arith.constant 0 : index
    %23 = vector.load %arg6[%c0_15, %c0_16] : memref<3x128xf32, #tpu.memory_space<vmem>>, vector<3x128xf32>
    tpu.vector_store %arg6[%c0_15, %c0_16], %22 {strides = array<i32>} : memref<3x128xf32, #tpu.memory_space<vmem>>, vector<3x128xf32>,
    return
  }
  func.func @transform_0(%arg0: i32) -> (i32, i32) {
    %c0_i32 = arith.constant 0 : i32
    %c0_i32_0 = arith.constant 0 : i32
    return %c0_i32, %arg0 : i32, i32
  }
  func.func @transform_1(%arg0: i32) -> (i32, i32) {
    %c0_i32 = arith.constant 0 : i32
    %c0_i32_0 = arith.constant 0 : i32
    %c0_i32_1 = arith.constant 0 : i32
    return %c0_i32, %c0_i32_0 : i32, i32
  }
  func.func @transform_2(%arg0: i32) -> (i32, i32) {
    %c0_i32 = arith.constant 0 : i32
    %c0_i32_0 = arith.constant 0 : i32
    %c0_i32_1 = arith.constant 0 : i32
    return %c0_i32, %c0_i32_0 : i32, i32
  }
  func.func @transform_3(%arg0: i32) -> (i32, i32) {
    %c0_i32 = arith.constant 0 : i32
    %c0_i32_0 = arith.constant 0 : i32
    %c0_i32_1 = arith.constant 0 : i32
    return %c0_i32, %c0_i32_0 : i32, i32
  }
  func.func @transform_4(%arg0: i32) -> (i32, i32) {
    %c0_i32 = arith.constant 0 : i32
    %c0_i32_0 = arith.constant 0 : i32
    %c0_i32_1 = arith.constant 0 : i32
    return %c0_i32, %c0_i32_0 : i32, i32
  }
  func.func @transform_5(%arg0: i32) -> (i32, i32) {
    %c0_i32 = arith.constant 0 : i32
    %c0_i32_0 = arith.constant 0 : i32
    return %c0_i32, %arg0 : i32, i32
  }
}

</mosaic_0001>

<bundles_post_ra>
// kernel: tpu_custom_call.1
= control target key start
LH: loop header
LB: loop body
LE: loop exit
PB: predicated region body
PF: predicated region fallthrough
CT: control target
= control target key end

     0   :  { %vm73_vm0 = vcmask 1044480   ;;  %vm66_vm1 = vcmask 80896   ;;  %v331_v8 = vmov 0   ;;  %s416_s0 = inlined_call_operand.vmem [shape: f32[10,128], index: 0, kind: input, shape index: {}]   ;;  %s417_s1 = inlined_call_operand.vmem [shape: bf16[32,10], index: 1, kind: input, shape index: {}]   ;;  %s418_s2 = inlined_call_operand.vmem [shape: bf16[16,32], index: 2, kind: input, shape index: {}]   ;;  %s419_s3 = inlined_call_operand.vmem [shape: bf16[3,16], index: 3, kind: input, shape index: {}]   ;;  %s420_s4 = inlined_call_operand.vmem [shape: f32[64,1], index: 4, kind: input, shape index: {}]   ;;  %s421_s5 = inlined_call_operand.hbm [shape: f32[3,128], index: 5, kind: output, shape index: {}]  }
   0x1   :  { %v22_v0 = vld [vmem:[%s416_s0] sm:$0xff]  ;;  %v23_v1 = vld [vmem:[%s416_s0 + $0x8] sm:$0x3]  ;;  %v27_v7 = vld [vmem:[%s420_s4 + $0x10] sm:$0xff]  ;;  %302 = vset.pattern.permute.xlu0 %v331_v8  ;;  %303 = vset.pattern.permute.xlu1 %v331_v8 }
   0x2   :  { %v24_v2 = vpack.c.bf16 %v23_v1, %v22_v0  ;;  %v304_v3 = vld [vmem:[%s417_s1] sm:$0xff]   ;;  %v305_v6 = vld [vmem:[%s417_s1 + $0x8] sm:$0xff]  }
   0x3   :  { %v25_v4 = vld [vmem:[%s420_s4] sm:$0xff]  ;;  %279 = vmatprep.mubr.msk.bf16.mxu0 %vm66_vm1, %v304_v3 }
   0x4   :  { %297 = vmatprep.subr.msk.bf16.mxu0 %vm73_vm0, %v24_v2  ;;  %v75_v5 = vsel %vm73_vm0, %v24_v2, 0  ;;  %38 = vperm.xlu0 %302, %v25_v4  }
   0x5   :  { %278 = vmatpush3.bf16.msra.mxu0 %v75_v5 }
   0x6   :  { %10 = vsyncpa [#allocation3], 0  ;;  %v26_v9 = vld [vmem:[%s420_s4 + $0x8] sm:$0xff]  ;;  %48 = vperm.xlu1 %303, %v27_v7   ;;  %v28_v10 = vld [vmem:[%s420_s4 + $0x18] sm:$0xff]  ;;  %v332_v14 = vmov 0.0   ;;  %vm333_vm2 = vmmov 0  }
   0x7   :  { %v29_v11 = vld [vmem:[%s420_s4 + $0x20] sm:$0xff]  ;;  %v30_v12 = vld [vmem:[%s420_s4 + $0x28] sm:$0xff]  ;;  %v31_v13 = vld [vmem:[%s420_s4 + $0x30] sm:$0x7]  ;;  %283 = vmatprep.subr.bf16.mxu1 %v332_v14  ;;  %291 = vmatprep.subr.bf16.mxu0 %v332_v14  ;;  %vm149_vm3 = vcmask 261120   ;;  %vm203_vm4 = vcmask 130048  }
   0x8   :  { %280 = vmatmul.mubr.msk.bf16.vlgmr.msra.gmra.mrb[0].mxu0 %vm66_vm1, %v305_v6  ;;  %43 = vperm.xlu0 %302, %v26_v9   ;;  %v306_v33 = vld [vmem:[%s418_s2] sm:$0xff]   ;;  %s334_s2 = smov [#allocation2]  }
   0x9   :  { %287 = vmatprep.mubr.msk.bf16.mxu1 %vm333_vm2, %v332_v14  ;;  %293 = vmatprep.mubr.msk.bf16.mxu0 %vm333_vm2, %v332_v14  ;;  %v196_v45 = vld [vmem:[%s419_s3] sm:$0x3]  ;;  %s254_s16 = sshll.u32 %s334_s2, 4  ;;  %s255_s16 = int_to_ptr.vmem [resolvable:$true] %s254_s16 }
   0xa   :  { %53 = vperm.xlu1 %303, %v28_v10   ;;  %s307_s17 = scalar_lea.vmem %s255_s16, 64  ;;  %p312_p1 = scmp.lt.s32.totalorder %s255_s16, %s255_s16 }
   0xb   :  { %p308_p0 = scmp.ne.s32.totalorder %s255_s16, %s307_s17  ;;  %p313_p2 = scmp.lt.s32.totalorder %s307_s17, %s307_s17 }
   0xc   :  { %136 = vperm.xlu0 %302, %v29_v11  }
   0xd   :  { %p314_p3 = por %p313_p2, %p312_p1 }
   0xe   :  { %141 = vperm.xlu1 %303, %v30_v12  }
   0xf   :  { %p315_p4 = pnand %p314_p3, %p308_p0 }
  0x10   :  { %200 = vperm.xlu0 %302, %v31_v13  }
  0x83   :  { %v39_v16 = vpop.permute.xlu0 %38 }
  0x85   :  { %v49_v15 = vpop.permute.xlu1 %48 }
  0x87   :  { %v44_v23 = vpop.permute.xlu0 %43 }
  0x89   :  { %v54_v20 = vpop.permute.xlu1 %53 }
  0x8b   :  { %v137_v34 = vpop.permute.xlu0 %136 }
  0x8d   :  { %v142_v38 = vpop.permute.xlu1 %141 }
  0x8f   :  { %v201_v46 = vpop.permute.xlu0 %200 }
  0xdb   :  { %v281_v17 = vpop.f32.mrb[0].mxu0 }
  0xdc   :  { %v120_v18 = vadd.f32 %v281_v17, %v49_v15  ;;  %v111_v19 = vpop.f32.mrb[1].mxu0 }
  0xdd   :  { %v112_v21 = vadd.f32 %v111_v19, %v39_v16  ;;  %v282_v22 = vpop.f32.mrb[2].mxu0 }
  0xde   :  { %v123_v24 = vadd.f32 %v282_v22, %v54_v20  ;;  %v114_v25 = vpop.f32.mrb[3].mxu0  ;;  %v128_v27 = vmax.f32 %v120_v18, 0.0 }
  0xdf   :  { %v115_v26 = vadd.f32 %v114_v25, %v44_v23  ;;  %v126_v29 = vmax.f32 %v112_v21, 0.0 }
  0xe0   :  { %v129_v28 = vmax.f32 %v123_v24, 0.0 }
  0xe1   :  { %v127_v30 = vmax.f32 %v115_v26, 0.0 }
  0xe2   :  { %v133_v31 = vpack.c.bf16 %v129_v28, %v128_v27 }
  0xe3   :  { %v132_v32 = vpack.c.bf16 %v127_v30, %v126_v29 }
  0xe5   :  { %284 = vmatpush3.bf16.msra.mxu1 %v132_v32 }
  0xe6   :  { %285 = vmatprep.subr.bf16.mxu1 %v332_v14 }
  0xe9   :  { %286 = vmatpush3.bf16.msra.mxu1 %v133_v31 }
  0xec   :  { %288 = vmatmul.mubr.msk.bf16.vlgmr.msra.gmra.mrb[0].mxu1 %vm149_vm3, %v306_v33 }
 0x1bf   :  { %v187_v35 = vpop.f32.mrb[0].mxu1 }
 0x1c0   :  { %v188_v36 = vadd.f32 %v187_v35, %v137_v34  ;;  %v289_v37 = vpop.f32.mrb[1].mxu1 }
 0x1c1   :  { %v190_v39 = vpop.f32.mrb[2].mxu1 }
 0x1c2   :  { %v191_v40 = vadd.f32 %v190_v39, %v142_v38  ;;  %v290_v41 = vpop.f32.mrb[3].mxu1  ;;  %v194_v42 = vmax.f32 %v188_v36, 0.0 }
 0x1c4   :  { %v195_v43 = vmax.f32 %v191_v40, 0.0 }
 0x1c6   :  { %v197_v44 = vpack.c.bf16 %v195_v43, %v194_v42 }
 0x1c8   :  { %292 = vmatpush3.bf16.msra.mxu0 %v197_v44 }
 0x1cb   :  { %294 = vmatmul.mubr.msk.bf16.vlgmr.msra.gmra.mrb[4].mxu0 %vm203_vm4, %v196_v45 }
 0x29e   :  { %v241_v47 = vpop.f32.mrb[4].mxu0 }
 0x29f   :  { %v242_v48 = vadd.f32 %v241_v47, %v201_v46  ;;  %v295_v49 = vpop.f32.mrb[5].mxu0 }
 0x2a0   :  { %v244_v50 = vpop.f32.mrb[6].mxu0 }
 0x2a1   :  { %247 = vst [vmem:[#allocation2] sm:$0x7] %v242_v48  ;;  %v296_v51 = vpop.f32.mrb[7].mxu0 }
 0x2a2   :  { %318 = shalt.err (!%p315_p4)
}
 0x2a3   :  { %s319_s19 = scalar_lea.hbm %s421_s5, 64 }
 0x2a4   :  { %p320_p5 = scmp.ne.s32.totalorder %s421_s5, %s319_s19  ;;  %p323_p6 = scmp.lt.u32.totalorder %s319_s19, %s421_s5 }
 0x2a6   :  { %p325_p7 = pnand %p323_p6, %p320_p5 }
 0x2a8   :  { %328 = shalt.err (!%p325_p7)
}
 0x2a9   :  { %257 = dma.vmem_to_hbm [thread:$0]  %s255_s16, 64, %s421_s5, [#allocation3]  }
 0x2aa   :  { %329 = dma.done.wait [#allocation3], 64  }
 0x2ab   :  { %330 = vsyncadd [#allocation3], 4294967232 }
 0x2ac   :  { %261 = vsyncpa [#allocation3], 1 }

</bundles_post_ra>
